<compile_context>
chip_gen: v5e
topology: v5e:2x2
jax: 0.10.0
libtpu: 0.0.40
codegen_flags: <defaults>
</compile_context>

<pallas_src>
import functools

import jax
import jax.numpy as jnp
from jax import lax
from jax.experimental import pallas as pl
from jax.experimental.pallas import tpu as pltpu

NA = 3               # anchors per scale
NC = 80              # classes
NO = NC + 5          # outputs per anchor (85)
CP = 128             # lane-padded per-anchor head GEMM width (85 -> 128)
DOWN = 2             # backbone downsample factor == decode stride
C1 = 16              # backbone feature channels
KIN = 3              # input image channels
K_RAW = 3 * 3 * KIN  # im2col K = 27
KP = 32              # padded im2col K (27 taps + 1.0 bias lane + zeros)


def _sigmoid(x):
    # single EUP tanh + 2 cheap VPU ops (vs. exp + divide on v5e)
    return 0.5 * jnp.tanh(0.5 * x) + 0.5


# --------------------------------------------------------------------------
# Fused Pallas kernel: conv GEMM + SiLU + head GEMM + sigmoid + YOLO decode
# --------------------------------------------------------------------------
def _fused_yolo_kernel(patches_ref, w1_ref, w2_ref, b2_ref, anch_ref, o_ref,
                       *, wo, stride):
    """Per grid step (image n, spatial tile j):

      patches_ref : (1, TM, KP)      bf16  im2col rows (lane 27 == 1.0 bias lane)
      w1_ref      : (KP, C1)         bf16  backbone conv weight (row 27 == b1)
      w2_ref      : (C1, NA*CP)      bf16  head weight (anchor-major, lane-padded)
      b2_ref      : (1, NA*CP)       f32
      anch_ref    : (1, NA*CP)       f32   4*anchor at cols a*CP+{2,3}, 1 elsewhere
      o_ref       : (1, NA, TM, NO)  f32   decoded predictions (final layout)
    """
    j = pl.program_id(1)
    tm = patches_ref.shape[1]
    na = o_ref.shape[1]
    no = o_ref.shape[3]
    cp = anch_ref.shape[1] // na

    # --- backbone conv (im2col GEMM, bias folded into w1) + SiLU ---
    x = patches_ref[0]                                            # (TM, KP)
    feat = jnp.dot(x, w1_ref[...], preferred_element_type=jnp.float32)
    feat = feat * _sigmoid(feat)                                  # SiLU

    # --- detect head (1x1 conv GEMM) + sigmoid ---
    acc = jnp.dot(feat.astype(w2_ref.dtype), w2_ref[...],
                  preferred_element_type=jnp.float32)
    s = _sigmoid(acc + b2_ref[...])                               # (TM, NA*CP)

    # --- in-kernel spatial grid (no HBM-materialized grid tensors) ---
    # rows of this tile are flattened (gy, gx) positions of image n
    row = j * tm + lax.broadcasted_iota(jnp.int32, (tm, 1), 0)
    row_f = row.astype(jnp.float32)
    gy = jnp.floor(row_f * (1.0 / wo))
    gx = row_f - gy * wo
    # exact off-by-one correction for f32 reciprocal rounding at boundaries
    gy = jnp.where(gx < 0.0, gy - 1.0, jnp.where(gx >= wo, gy + 1.0, gy))
    gx = jnp.where(gx < 0.0, gx + wo, jnp.where(gx >= wo, gx - wo, gx))

    col = lax.broadcasted_iota(jnp.int32, (tm, cp), 1)
    grid_xy = jnp.where(col == 0, gx, jnp.where(col == 1, gy, 0.0))
    is_xy = col < 2
    is_wh = jnp.logical_and(col >= 2, col < 4)

    # hoisted out of the anchor loop (shared across anchors)
    xy_off = (grid_xy - 0.5) * stride                             # (TM, CP)
    two_stride = 2.0 * stride

    # --- YOLOv5 decode per anchor (static unroll, lane-aligned slices) ---
    for a in range(na):
        sa = s[:, a * cp:(a + 1) * cp]                            # (TM, CP)
        anch4 = anch_ref[:, a * cp:(a + 1) * cp]                  # (1, CP)
        xy = sa * two_stride + xy_off        # == (2*sa - 0.5 + grid) * stride
        wh = sa * sa * anch4                 # == (2*sa)^2 * anchor
        dec = jnp.where(is_xy, xy, jnp.where(is_wh, wh, sa))
        o_ref[0, a, :, :] = dec[:, :no]


def _choose_tile_rows(hw, n_images, cap=4096):
    """Rows per spatial tile: multiple of 8 (or the full extent).  For a
    single image, split so the grid has >= 2 steps (feeds both v7x TCs)."""
    tm = min(hw, cap)
    if tm < hw:
        tm = (tm // 8) * 8
    if n_images == 1 and tm == hw and hw > 8:
        half = -(-hw // 2)
        half = -(-half // 8) * 8
        if half < hw:
            tm = half
    return max(tm, 1)


# --------------------------------------------------------------------------
# DetectMultiBackend-equivalent wrapper
# --------------------------------------------------------------------------
def init_params(key):
    k1, k2, k3, k4 = jax.random.split(key, 4)
    return {
        # backbone conv: 3x3, C_in=3 -> 16 channels, im2col weight (27, 16)
        "w1": jax.random.normal(k1, (K_RAW, C1), jnp.float32) * 0.1,
        "b1": jax.random.normal(k2, (C1,), jnp.float32) * 0.1,
        # detect head: 1x1 conv, 16 -> na * no channels (anchor-major)
        "w2": jax.random.normal(k3, (C1, NA * NO), jnp.float32) * 0.1,
        "b2": jax.random.normal(k4, (NA * NO,), jnp.float32) * 0.1,
        # anchors in output-pixel units, deterministic
        "anchors": jnp.array(
            [[1.25, 1.625], [2.0, 3.75], [4.125, 2.875]], jnp.float32) * DOWN,
    }


def detect_multibackend_forward(im, params):
    """im: NCHW float32 (N, 3, H, W)  ->  y: (N, na*ny*nx, 5+nc)."""
    N, C, H, W = im.shape
    Ho, Wo = H // DOWN, W // DOWN
    HW = Ho * Wo
    assert HW < (1 << 24), "f32 row-index trick needs HW < 2^24"

    # ---- im2col for the 3x3 / stride-2 backbone conv (small XLA glue) ----
    # built directly at width KP=32 in bf16: 27 taps, a 1.0 bias lane, zeros.
    x = jnp.transpose(im, (0, 2, 3, 1)).astype(jnp.bfloat16)      # NHWC bf16
    xp = jnp.pad(x, ((0, 0), (1, 1), (1, 1), (0, 0)))             # pad=1
    cols = [xp[:, dy:dy + DOWN * Ho:DOWN, dx:dx + DOWN * Wo:DOWN, :]
            for dy in range(3) for dx in range(3)]
    cols.append(jnp.ones((N, Ho, Wo, 1), jnp.bfloat16))           # bias lane 27
    cols.append(jnp.zeros((N, Ho, Wo, KP - K_RAW - 1), jnp.bfloat16))
    patches = jnp.concatenate(cols, axis=-1).reshape(N, HW, KP)

    # ---- weights: fold b1 into w1 row 27; pad head channels 85 -> 128 ----
    w1 = jnp.zeros((KP, C1), jnp.float32)
    w1 = w1.at[:K_RAW].set(params["w1"]).at[K_RAW].set(params["b1"])
    w1 = w1.astype(jnp.bfloat16)
    w2 = jnp.pad(params["w2"].reshape(C1, NA, NO),
                 ((0, 0), (0, 0), (0, CP - NO))).reshape(C1, NA * CP)
    w2 = w2.astype(jnp.bfloat16)
    b2 = jnp.pad(params["b2"].reshape(NA, NO),
                 ((0, 0), (0, CP - NO))).reshape(1, NA * CP).astype(jnp.float32)
    # per-channel anchor row, pre-scaled by 4: 4*anchor at cols a*CP+{2,3}
    anch4 = jnp.ones((NA, CP), jnp.float32).at[:, 2:4].set(
        4.0 * params["anchors"]).reshape(1, NA * CP)

    TM = _choose_tile_rows(HW, N)
    n_tiles = pl.cdiv(HW, TM)

    out = pl.pallas_call(
        functools.partial(_fused_yolo_kernel, wo=Wo, stride=float(DOWN)),
        out_shape=jax.ShapeDtypeStruct((N, NA, HW, NO), jnp.float32),
        grid=(N, n_tiles),
        in_specs=[
            pl.BlockSpec((1, TM, KP), lambda n, j: (n, j, 0)),      # patches
            pl.BlockSpec((KP, C1), lambda n, j: (0, 0)),            # w1 (+b1)
            pl.BlockSpec((C1, NA * CP), lambda n, j: (0, 0)),       # w2
            pl.BlockSpec((1, NA * CP), lambda n, j: (0, 0)),        # b2
            pl.BlockSpec((1, NA * CP), lambda n, j: (0, 0)),        # anchors*4
        ],
        out_specs=pl.BlockSpec((1, NA, TM, NO), lambda n, j: (n, 0, j, 0)),
        compiler_params=pltpu.CompilerParams(
            dimension_semantics=("parallel", "parallel"),
            vmem_limit_bytes=32 * 1024 * 1024,
        ),
    )(patches, w1, w2, b2, anch4)

    # (N, NA, HW, NO) -> (N, NA*HW, NO): adjacent-dim merge, free (no copy)
    return out.reshape(N, NA * HW, NO)


if __name__ == "__main__":
    key = jax.random.PRNGKey(0)
    k_params, k_in = jax.random.split(key)
    params = init_params(k_params)

    # small NCHW input consistent with the module's forward (images, 3 ch)
    im = jax.random.normal(k_in, (2, 3, 16, 16), jnp.float32)

    y = detect_multibackend_forward(im, params)
    jax.block_until_ready(y)
    assert y.shape == (2, NA * (16 // DOWN) * (16 // DOWN), NO)
    assert bool(jnp.isfinite(y).all())
    print("KERNEL_OK")
</pallas_src>

<mosaic_0001>
module attributes {stable_mosaic.version = 11 : i64} {
  func.func @_fused_yolo_kernel(%arg0: i32, %arg1: i32, %arg2: memref<1x64x32xbf16, #tpu.memory_space<vmem>>, %arg3: memref<32x16xbf16, #tpu.memory_space<vmem>>, %arg4: memref<16x384xbf16, #tpu.memory_space<vmem>>, %arg5: memref<1x384xf32, #tpu.memory_space<vmem>>, %arg6: memref<1x384xf32, #tpu.memory_space<vmem>>, %arg7: memref<1x3x64x85xf32, #tpu.memory_space<vmem>>) attributes {dimension_semantics = [#tpu.dimension_semantics<parallel>, #tpu.dimension_semantics<parallel>], iteration_bounds = array<i64: 2, 1>, scalar_prefetch = 0 : i64, scratch_operands = 0 : i64, tpu.core_type = #tpu.core_type<tc>, window_params = [{transform_indices = @transform_0, window_bounds = array<i64: 1, 64, 32>}, {pipeline_mode = #tpu.pipeline_mode<synchronous>, transform_indices = @transform_1, window_bounds = array<i64: 32, 16>}, {pipeline_mode = #tpu.pipeline_mode<synchronous>, transform_indices = @transform_2, window_bounds = array<i64: 16, 384>}, {pipeline_mode = #tpu.pipeline_mode<synchronous>, transform_indices = @transform_3, window_bounds = array<i64: 1, 384>}, {pipeline_mode = #tpu.pipeline_mode<synchronous>, transform_indices = @transform_4, window_bounds = array<i64: 1, 384>}, {transform_indices = @transform_5, window_bounds = array<i64: 1, 3, 64, 85>}]} {
    %c0 = arith.constant 0 : index
    %c0_0 = arith.constant 0 : index
    %c0_1 = arith.constant 0 : index
    %0 = vector.load %arg2[%c0, %c0_0, %c0_1] : memref<1x64x32xbf16, #tpu.memory_space<vmem>>, vector<1x64x32xbf16>
    %1 = vector.shape_cast %0 : vector<1x64x32xbf16> to vector<64x32xbf16>
    %c0_2 = arith.constant 0 : index
    %c0_3 = arith.constant 0 : index
    %2 = vector.load %arg3[%c0_2, %c0_3] : memref<32x16xbf16, #tpu.memory_space<vmem>>, vector<32x16xbf16>
    %cst = arith.constant dense<0.000000e+00> : vector<64x16xf32>
    %3 = tpu.matmul %1, %2, %cst {dimension_numbers = #tpu.dot_dimension_numbers<[1], [0], [0], [1], [0, 0, 1, 1], [], []>} : vector<64x32xbf16>, vector<32x16xbf16>, vector<64x16xf32> -> vector<64x16xf32>
    %cst_4 = arith.constant 5.000000e-01 : f32
    %4 = vector.broadcast %cst_4 : f32 to vector<64x16xf32>
    %5 = arith.mulf %4, %3 : vector<64x16xf32>
    %6 = math.tanh %5 : vector<64x16xf32>
    %cst_5 = arith.constant 5.000000e-01 : f32
    %7 = vector.broadcast %cst_5 : f32 to vector<64x16xf32>
    %8 = arith.mulf %7, %6 : vector<64x16xf32>
    %cst_6 = arith.constant 5.000000e-01 : f32
    %9 = vector.broadcast %cst_6 : f32 to vector<64x16xf32>
    %10 = arith.addf %8, %9 : vector<64x16xf32>
    %11 = arith.mulf %3, %10 : vector<64x16xf32>
    %12 = arith.truncf %11 : vector<64x16xf32> to vector<64x16xbf16>
    %c0_7 = arith.constant 0 : index
    %c0_8 = arith.constant 0 : index
    %13 = vector.load %arg4[%c0_7, %c0_8] : memref<16x384xbf16, #tpu.memory_space<vmem>>, vector<16x384xbf16>
    %cst_9 = arith.constant dense<0.000000e+00> : vector<64x384xf32>
    %14 = tpu.matmul %12, %13, %cst_9 {dimension_numbers = #tpu.dot_dimension_numbers<[1], [0], [0], [1], [0, 0, 1, 1], [], []>} : vector<64x16xbf16>, vector<16x384xbf16>, vector<64x384xf32> -> vector<64x384xf32>
    %c0_10 = arith.constant 0 : index
    %c0_11 = arith.constant 0 : index
    %15 = vector.load %arg5[%c0_10, %c0_11] : memref<1x384xf32, #tpu.memory_space<vmem>>, vector<1x384xf32>
    %16 = vector.broadcast %15 : vector<1x384xf32> to vector<64x384xf32>
    %17 = arith.addf %14, %16 : vector<64x384xf32>
    %cst_12 = arith.constant 5.000000e-01 : f32
    %18 = vector.broadcast %cst_12 : f32 to vector<64x384xf32>
    %19 = arith.mulf %18, %17 : vector<64x384xf32>
    %20 = math.tanh %19 : vector<64x384xf32>
    %cst_13 = arith.constant 5.000000e-01 : f32
    %21 = vector.broadcast %cst_13 : f32 to vector<64x384xf32>
    %22 = arith.mulf %21, %20 : vector<64x384xf32>
    %cst_14 = arith.constant 5.000000e-01 : f32
    %23 = vector.broadcast %cst_14 : f32 to vector<64x384xf32>
    %24 = arith.addf %22, %23 : vector<64x384xf32>
    %c64_i32 = arith.constant 64 : i32
    %25 = arith.muli %arg1, %c64_i32 : i32
    %26 = tpu.iota {dimensions = array<i32: 0>} : vector<64x1xi32>
    %27 = vector.broadcast %25 : i32 to vector<64x1xi32>
    %28 = arith.addi %27, %26 : vector<64x1xi32>
    %29 = arith.sitofp %28 : vector<64x1xi32> to vector<64x1xf32>
    %cst_15 = arith.constant 1.250000e-01 : f32
    %30 = vector.broadcast %cst_15 : f32 to vector<64x1xf32>
    %31 = arith.mulf %29, %30 : vector<64x1xf32>
    %32 = math.floor %31 : vector<64x1xf32>
    %cst_16 = arith.constant 8.000000e+00 : f32
    %33 = vector.broadcast %cst_16 : f32 to vector<64x1xf32>
    %34 = arith.mulf %32, %33 : vector<64x1xf32>
    %35 = arith.subf %29, %34 : vector<64x1xf32>
    %cst_17 = arith.constant 0.000000e+00 : f32
    %36 = vector.broadcast %cst_17 : f32 to vector<64x1xf32>
    %37 = arith.cmpf olt, %35, %36 : vector<64x1xf32>
    %cst_18 = arith.constant 1.000000e+00 : f32
    %38 = vector.broadcast %cst_18 : f32 to vector<64x1xf32>
    %39 = arith.subf %32, %38 : vector<64x1xf32>
    %cst_19 = arith.constant 8.000000e+00 : f32
    %40 = vector.broadcast %cst_19 : f32 to vector<64x1xf32>
    %41 = arith.cmpf oge, %35, %40 : vector<64x1xf32>
    %cst_20 = arith.constant 1.000000e+00 : f32
    %42 = vector.broadcast %cst_20 : f32 to vector<64x1xf32>
    %43 = arith.addf %32, %42 : vector<64x1xf32>
    %44 = arith.select %41, %43, %32 : vector<64x1xi1>, vector<64x1xf32>
    %45 = arith.select %37, %39, %44 : vector<64x1xi1>, vector<64x1xf32>
    %cst_21 = arith.constant 0.000000e+00 : f32
    %46 = vector.broadcast %cst_21 : f32 to vector<64x1xf32>
    %47 = arith.cmpf olt, %35, %46 : vector<64x1xf32>
    %cst_22 = arith.constant 8.000000e+00 : f32
    %48 = vector.broadcast %cst_22 : f32 to vector<64x1xf32>
    %49 = arith.addf %35, %48 : vector<64x1xf32>
    %cst_23 = arith.constant 8.000000e+00 : f32
    %50 = vector.broadcast %cst_23 : f32 to vector<64x1xf32>
    %51 = arith.cmpf oge, %35, %50 : vector<64x1xf32>
    %cst_24 = arith.constant 8.000000e+00 : f32
    %52 = vector.broadcast %cst_24 : f32 to vector<64x1xf32>
    %53 = arith.subf %35, %52 : vector<64x1xf32>
    %54 = arith.select %51, %53, %35 : vector<64x1xi1>, vector<64x1xf32>
    %55 = arith.select %47, %49, %54 : vector<64x1xi1>, vector<64x1xf32>
    %56 = tpu.iota {dimensions = array<i32: 1>} : vector<64x128xi32>
    %c0_i32 = arith.constant 0 : i32
    %57 = vector.broadcast %c0_i32 : i32 to vector<64x128xi32>
    %58 = arith.cmpi eq, %56, %57 : vector<64x128xi32>
    %c1_i32 = arith.constant 1 : i32
    %59 = vector.broadcast %c1_i32 : i32 to vector<64x128xi32>
    %60 = arith.cmpi eq, %56, %59 : vector<64x128xi32>
    %cst_25 = arith.constant 0.000000e+00 : f32
    %61 = vector.shape_cast %45 : vector<64x1xf32> to vector<64x1xf32>
    %62 = vector.broadcast %61 : vector<64x1xf32> to vector<64x128xf32>
    %63 = vector.broadcast %cst_25 : f32 to vector<64x128xf32>
    %64 = arith.select %60, %62, %63 : vector<64x128xi1>, vector<64x128xf32>
    %65 = vector.shape_cast %55 : vector<64x1xf32> to vector<64x1xf32>
    %66 = vector.broadcast %65 : vector<64x1xf32> to vector<64x128xf32>
    %67 = arith.select %58, %66, %64 : vector<64x128xi1>, vector<64x128xf32>
    %c2_i32 = arith.constant 2 : i32
    %68 = vector.broadcast %c2_i32 : i32 to vector<64x128xi32>
    %69 = arith.cmpi slt, %56, %68 : vector<64x128xi32>
    %c2_i32_26 = arith.constant 2 : i32
    %70 = vector.broadcast %c2_i32_26 : i32 to vector<64x128xi32>
    %71 = arith.cmpi sge, %56, %70 : vector<64x128xi32>
    %c4_i32 = arith.constant 4 : i32
    %72 = vector.broadcast %c4_i32 : i32 to vector<64x128xi32>
    %73 = arith.cmpi slt, %56, %72 : vector<64x128xi32>
    %74 = arith.andi %71, %73 : vector<64x128xi1>
    %cst_27 = arith.constant 5.000000e-01 : f32
    %75 = vector.broadcast %cst_27 : f32 to vector<64x128xf32>
    %76 = arith.subf %67, %75 : vector<64x128xf32>
    %cst_28 = arith.constant 2.000000e+00 : f32
    %77 = vector.broadcast %cst_28 : f32 to vector<64x128xf32>
    %78 = arith.mulf %76, %77 : vector<64x128xf32>
    %79 = vector.extract_strided_slice %24 {offsets = [0, 0], sizes = [64, 128], strides = [1, 1]} : vector<64x384xf32> to vector<64x128xf32>
    %c0_29 = arith.constant 0 : index
    %c0_30 = arith.constant 0 : index
    %80 = vector.load %arg6[%c0_29, %c0_30] : memref<1x384xf32, #tpu.memory_space<vmem>>, vector<1x128xf32>
    %cst_31 = arith.constant 4.000000e+00 : f32
    %81 = vector.broadcast %cst_31 : f32 to vector<64x128xf32>
    %82 = arith.mulf %79, %81 : vector<64x128xf32>
    %83 = arith.addf %82, %78 : vector<64x128xf32>
    %84 = arith.mulf %79, %79 : vector<64x128xf32>
    %85 = vector.broadcast %80 : vector<1x128xf32> to vector<64x128xf32>
    %86 = arith.mulf %84, %85 : vector<64x128xf32>
    %87 = arith.select %74, %86, %79 : vector<64x128xi1>, vector<64x128xf32>
    %88 = arith.select %69, %83, %87 : vector<64x128xi1>, vector<64x128xf32>
    %89 = vector.extract_strided_slice %88 {offsets = [0, 0], sizes = [64, 85], strides = [1, 1]} : vector<64x128xf32> to vector<64x85xf32>
    %c0_32 = arith.constant 0 : index
    %c0_33 = arith.constant 0 : index
    %c0_34 = arith.constant 0 : index
    %c0_35 = arith.constant 0 : index
    %90 = vector.load %arg7[%c0_32, %c0_33, %c0_34, %c0_35] : memref<1x3x64x85xf32, #tpu.memory_space<vmem>>, vector<1x1x64x85xf32>
    %91 = vector.shape_cast %90 : vector<1x1x64x85xf32> to vector<64x85xf32>
    %92 = vector.shape_cast %89 : vector<64x85xf32> to vector<1x1x64x85xf32>
    tpu.vector_store %arg7[%c0_32, %c0_33, %c0_34, %c0_35], %92 {strides = array<i32>} : memref<1x3x64x85xf32, #tpu.memory_space<vmem>>, vector<1x1x64x85xf32>,
    %93 = vector.extract_strided_slice %24 {offsets = [0, 128], sizes = [64, 128], strides = [1, 1]} : vector<64x384xf32> to vector<64x128xf32>
    %c0_36 = arith.constant 0 : index
    %c128 = arith.constant 128 : index
    %94 = vector.load %arg6[%c0_36, %c128] : memref<1x384xf32, #tpu.memory_space<vmem>>, vector<1x128xf32>
    %cst_37 = arith.constant 4.000000e+00 : f32
    %95 = vector.broadcast %cst_37 : f32 to vector<64x128xf32>
    %96 = arith.mulf %93, %95 : vector<64x128xf32>
    %97 = arith.addf %96, %78 : vector<64x128xf32>
    %98 = arith.mulf %93, %93 : vector<64x128xf32>
    %99 = vector.broadcast %94 : vector<1x128xf32> to vector<64x128xf32>
    %100 = arith.mulf %98, %99 : vector<64x128xf32>
    %101 = arith.select %74, %100, %93 : vector<64x128xi1>, vector<64x128xf32>
    %102 = arith.select %69, %97, %101 : vector<64x128xi1>, vector<64x128xf32>
    %103 = vector.extract_strided_slice %102 {offsets = [0, 0], sizes = [64, 85], strides = [1, 1]} : vector<64x128xf32> to vector<64x85xf32>
    %c0_38 = arith.constant 0 : index
    %c1 = arith.constant 1 : index
    %c0_39 = arith.constant 0 : index
    %c0_40 = arith.constant 0 : index
    %104 = vector.load %arg7[%c0_38, %c1, %c0_39, %c0_40] : memref<1x3x64x85xf32, #tpu.memory_space<vmem>>, vector<1x1x64x85xf32>
    %105 = vector.shape_cast %104 : vector<1x1x64x85xf32> to vector<64x85xf32>
    %106 = vector.shape_cast %103 : vector<64x85xf32> to vector<1x1x64x85xf32>
    tpu.vector_store %arg7[%c0_38, %c1, %c0_39, %c0_40], %106 {strides = array<i32>} : memref<1x3x64x85xf32, #tpu.memory_space<vmem>>, vector<1x1x64x85xf32>,
    %107 = vector.extract_strided_slice %24 {offsets = [0, 256], sizes = [64, 128], strides = [1, 1]} : vector<64x384xf32> to vector<64x128xf32>
    %c0_41 = arith.constant 0 : index
    %c256 = arith.constant 256 : index
    %108 = vector.load %arg6[%c0_41, %c256] : memref<1x384xf32, #tpu.memory_space<vmem>>, vector<1x128xf32>
    %cst_42 = arith.constant 4.000000e+00 : f32
    %109 = vector.broadcast %cst_42 : f32 to vector<64x128xf32>
    %110 = arith.mulf %107, %109 : vector<64x128xf32>
    %111 = arith.addf %110, %78 : vector<64x128xf32>
    %112 = arith.mulf %107, %107 : vector<64x128xf32>
    %113 = vector.broadcast %108 : vector<1x128xf32> to vector<64x128xf32>
    %114 = arith.mulf %112, %113 : vector<64x128xf32>
    %115 = arith.select %74, %114, %107 : vector<64x128xi1>, vector<64x128xf32>
    %116 = arith.select %69, %111, %115 : vector<64x128xi1>, vector<64x128xf32>
    %117 = vector.extract_strided_slice %116 {offsets = [0, 0], sizes = [64, 85], strides = [1, 1]} : vector<64x128xf32> to vector<64x85xf32>
    %c0_43 = arith.constant 0 : index
    %c2 = arith.constant 2 : index
    %c0_44 = arith.constant 0 : index
    %c0_45 = arith.constant 0 : index
    %118 = vector.load %arg7[%c0_43, %c2, %c0_44, %c0_45] : memref<1x3x64x85xf32, #tpu.memory_space<vmem>>, vector<1x1x64x85xf32>
    %119 = vector.shape_cast %118 : vector<1x1x64x85xf32> to vector<64x85xf32>
    %120 = vector.shape_cast %117 : vector<64x85xf32> to vector<1x1x64x85xf32>
    tpu.vector_store %arg7[%c0_43, %c2, %c0_44, %c0_45], %120 {strides = array<i32>} : memref<1x3x64x85xf32, #tpu.memory_space<vmem>>, vector<1x1x64x85xf32>,
    return
  }
  func.func @transform_0(%arg0: i32, %arg1: i32) -> (i32, i32, i32) {
    %c0_i32 = arith.constant 0 : i32
    %c0_i32_0 = arith.constant 0 : i32
    return %arg0, %arg1, %c0_i32 : i32, i32, i32
  }
  func.func @transform_1(%arg0: i32, %arg1: i32) -> (i32, i32) {
    %c0_i32 = arith.constant 0 : i32
    %c0_i32_0 = arith.constant 0 : i32
    %c0_i32_1 = arith.constant 0 : i32
    return %c0_i32, %c0_i32_0 : i32, i32
  }
  func.func @transform_2(%arg0: i32, %arg1: i32) -> (i32, i32) {
    %c0_i32 = arith.constant 0 : i32
    %c0_i32_0 = arith.constant 0 : i32
    %c0_i32_1 = arith.constant 0 : i32
    return %c0_i32, %c0_i32_0 : i32, i32
  }
  func.func @transform_3(%arg0: i32, %arg1: i32) -> (i32, i32) {
    %c0_i32 = arith.constant 0 : i32
    %c0_i32_0 = arith.constant 0 : i32
    %c0_i32_1 = arith.constant 0 : i32
    return %c0_i32, %c0_i32_0 : i32, i32
  }
  func.func @transform_4(%arg0: i32, %arg1: i32) -> (i32, i32) {
    %c0_i32 = arith.constant 0 : i32
    %c0_i32_0 = arith.constant 0 : i32
    %c0_i32_1 = arith.constant 0 : i32
    return %c0_i32, %c0_i32_0 : i32, i32
  }
  func.func @transform_5(%arg0: i32, %arg1: i32) -> (i32, i32, i32, i32) {
    %c0_i32 = arith.constant 0 : i32
    %c0_i32_0 = arith.constant 0 : i32
    %c0_i32_1 = arith.constant 0 : i32
    return %arg0, %c0_i32, %arg1, %c0_i32_0 : i32, i32, i32, i32
  }
}

</mosaic_0001>

<bundles_post_ra>
// kernel: tpu_custom_call.1
= control target key start
LH: loop header
LB: loop body
LE: loop exit
PB: predicated region body
PF: predicated region fallthrough
CT: control target
= control target key end

     0   :  { %10 = vsyncpa [#allocation3], 0  ;;  %s1915_s0 = inlined_call_operand.vmem [shape: bf16[2,64,32], index: 0, kind: input, shape index: {}]   ;;  %s1916_s1 = inlined_call_operand.vmem [shape: bf16[32,16], index: 1, kind: input, shape index: {}]   ;;  %s1917_s2 = inlined_call_operand.vmem [shape: bf16[16,384], index: 2, kind: input, shape index: {}]   ;;  %s1918_s3 = inlined_call_operand.vmem [shape: f32[1,384], index: 3, kind: input, shape index: {}]   ;;  %s1919_s4 = inlined_call_operand.vmem [shape: f32[1,384], index: 4, kind: input, shape index: {}]   ;;  %s1920_s5 = inlined_call_operand.hbm [shape: f32[2,3,64,85], index: 5, kind: output, shape index: {}]  }
   0x1   :  { %12 = vsyncpa [#allocation3 + $0x1], 0  ;;  %s1418_s18 = smov 0   ;;  %s1420_s19 = smov 0  }
   0x2   :  { %s1422_s20 = smov 0   ;;  %s1424_s21 = smov 0  }
   0x3   :  { %s1426_s22 = smov 0   ;;  %s1428_s23 = smov 0  }
   0x4 LB: > { %s1068_s24 = sadd.s32 4294967295, %s1384_s23   ;;  %s1069_s25 = sadd.s32 4294967294, %s1384_s23   ;;  %s1384_s23 = sphi %s1428_s23, %s18_s23   ;;  %s1380_s22 = sphi %s1426_s22, %s1929_s22   ;;  %s1376_s21 = sphi %s1424_s21, %s1928_s21   ;;  %s1372_s20 = sphi %s1422_s20, %s1927_s20   ;;  %s1368_s19 = sphi %s1420_s19, %s1926_s19   ;;  %s1364_s18 = sphi %s1418_s18, %s1925_s18  }
   0x5   : > { %s30_s26 = sadd.s32 1, %s1380_s22  ;;  %s151_s27 = sadd.s32 1, %s1372_s20 }
   0x6   : > { %p32_p0 = scmp.ge.s32.totalorder %s30_s26, 2  ;;  %p161_p1 = scmp.ne.s32.totalorder %s1372_s20, %s1368_s19 }
   0x7   : > { %p162_p2 = scmp.eq.s32.totalorder %s1068_s24, 1  ;;  %p167_p3 = scmp.ne.s32.totalorder %s1368_s19, %s1364_s18 }
   0x8   : > { %s1931_s26 = smov (%p32_p0, %s30_s26), 0  ;;  %p168_p5 = scmp.eq.s32.totalorder %s1069_s25, 1 }
   0x9   : > { %p1458_p4 = por %p162_p2, %p161_p1  ;;  %s146_s29 = ssub.s32 %s1380_s22, %s1931_s26 }
   0xa   : > { %p1072_p6 = scmp.ge.s32.totalorder %s1384_s23, 1  ;;  %p149_p7 = scmp.eq.s32.totalorder %s146_s29, 0 }
   0xb   : > { %p1465_p8 = por %p168_p5, %p167_p3  ;;  %p211_p9 = scmp.lt.s32.totalorder %s1384_s23, 3 }
   0xc   : > { %s1471_s6 = scalar_select %p149_p7, %s1372_s20, %s151_s27  }
   0xd   : > { %p212_p10 = pnand %p1072_p6, %p211_p9 }
   0xe   : > { %p244_p11 = scmp.lt.s32.totalorder (!%p212_p10), %s1376_s21, 1  ;;  %s1181_s9 = smul.u32 (!%p212_p10), 192, %s1376_s21 }
   0xf   : > { %215 = sbr.rel (%p212_p10) target bundleno = 408 (0x198), region = 40  ;;  %s1326_s27 = scalar_lea.hbm (!%p212_p10), %s1920_s5, 384 }
  0x14   : > { %v1176_v0 = vld [vmem:[%s1916_s1 + $0x8] sm:$0xff]  ;;  %v1175_v1 = vld [vmem:[%s1916_s1] sm:$0xff]  ;;  %s245_s11 = scalar_select %p244_p11, %s1376_s21, 1  ;;  %vm299_vm0 = vcmask 261120   ;;  %v1107_v10 = vld [vmem:[%s1917_s2 + $0xc] sm:$0xf0] }
  0x15   : > { %318 = vmatpush.bf16.msra.mxu0 %v1176_v0  ;;  %v1105_v6 = vld [vmem:[%s1917_s2] sm:$0xf]  ;;  %v1178_v7 = vld [vmem:[%s1917_s2 + $0x8] sm:$0xf0]  ;;  %v1177_v8 = vld [vmem:[%s1917_s2 + $0x4] sm:$0xf]  ;;  %s985_s21 = scalar_lea.hbm %s1920_s5, %s1181_s9 }
  0x16   : > { %s1170_s12 = sshll.u32 %s245_s11, 5  ;;  %v1106_v9 = vor.u32 %v1178_v7, %v1105_v6  ;;  %v1113_v11 = vld [vmem:[%s1917_s2 + $0x8] sm:$0xf]  ;;  %v1179_v12 = vld [vmem:[%s1917_s2 + $0x10] sm:$0xf0]  ;;  %v1110_v13 = vor.u32 %v1177_v8, %v1107_v10  ;;  %vm413_vm1 = vcmask 130048  }
  0x17   : > { %s251_s15 = scalar_lea.vmem %s1915_s0, %s1170_s12  ;;  %v1114_v14 = vor.u32 %v1179_v12, %v1113_v11  ;;  %vm840_vm15 = vcmask 695296   ;;  %s988_s13 = sshll.u32 %s985_s21, 4  ;;  %s989_s13 = int_to_ptr.hbm [resolvable:$true] %s988_s13 }
  0x18   : > { %v1171_v2 = vld [vmem:[%s251_s15] sm:$0xff]  ;;  %v1172_v3 = vld [vmem:[%s251_s15 + $0x8] sm:$0xff]  ;;  %v1173_v4 = vld [vmem:[%s251_s15 + $0x10] sm:$0xff]  ;;  %433 = vmatpush.bf16.msra.mxu1 %v1106_v9  ;;  %462 = vmatpush.bf16.msra.mxu2 %v1110_v13  ;;  %s1320_s16 = sshra.s32 %s989_s13, 4  ;;  %s1321_s16 = int_to_ptr.hbm [resolvable:$true] %s1320_s16 }
  0x19   : > { %319 = vmatpush.bf16.msra.mxu0 %v1175_v1  ;;  %v1174_v5 = vld [vmem:[%s251_s15 + $0x18] sm:$0xff]  ;;  %491 = vmatpush.bf16.msra.mxu3 %v1114_v14  ;;  %s240_s15 = sand.u32 1, %s1368_s19   ;;  %s1322_s17 = scalar_lea.hbm %s1321_s16, 192 }
  0x1a   : > { %s1583_s24 = smul.u32 192, %s240_s15  ;;  %s972_s14 = scalar_lea.sflag [#allocation3], %s240_s15 }
  0x1b   : > { %p1323_p12 = scmp.ne.s32.totalorder %s1321_s16, %s1322_s17  ;;  %p1327_p1 = scmp.lt.s32.totalorder %s1321_s16, %s1920_s5 }
  0x1c   : > { %1099 = vmatmul.msk.bf16.vlgmr.msra.gmra.mxu0 %vm299_vm0, %v1171_v2  ;;  %s1623_s8 = scalar_lea.vmem [#allocation2], %s1583_s24  ;;  %p1328_p2 = scmp.lt.s32.totalorder %s1326_s27, %s1322_s17 }
  0x1d   : > { %s986_s12 = sshll.u32 %s1623_s8, 4  ;;  %p1324_p13 = pnand %p1323_p12, %p1458_p4  ;;  %s987_s12 = int_to_ptr.vmem [resolvable:$true] %s986_s12 }
  0x1e   : > { %p1329_p3 = por %p1328_p2, %p1327_p1 }
  0x1f   : > { %p1325_p0 = pneg %p1324_p13 }
  0x21   : > { %p1330_p5 = pnand %p1329_p3, %p1325_p0 }
  0x2c   : > { %1100 = vmatmul.msk.bf16.gmra.mxu0 %vm299_vm0, %v1172_v3  ;;  %v610_v3 = vlaneseq }
  0x3c   : > { %1101 = vmatmul.msk.bf16.gmra.mxu0 %vm299_vm0, %v1173_v4  ;;  %v1514_v4 = vshrl.u32 %v610_v3, 7 }
  0x3e   : > { %v612_v8 = vadd.s32 8, %v1514_v4 }
  0x40   : > { %v629_v10 = vcvt.s32.f32 %v612_v8 }
  0x42   : > { %v637_v12 = vmul.f32 0.125, %v629_v10 }
  0x44   : > { %v645_v13 = vfloor.f32 %v637_v12 }
  0x4c   : > { %1102 = vmatmul.msk.bf16.gmra.mxu0 %vm299_vm0, %v1174_v5  ;;  %v628_v5 = vcvt.s32.f32 %v1514_v4 }
  0x4e   : > { %v636_v6 = vmul.f32 0.125, %v628_v5 }
  0x50   : > { %v644_v7 = vfloor.f32 %v636_v6 }
  0x52   : > { %v652_v9 = vmul.f32 8.0, %v644_v7  ;;  %v692_v14 = vadd.f32 1.0, %v644_v7 }
  0x54   : > { %v660_v11 = vsub.f32 %v628_v5, %v652_v9 }
  0x56   : > { %vm684_vm2 = vcmp.ge.f32.partialorder %v660_v11, 8.0  ;;  %vm668_vm3 = vcmp.lt.f32.partialorder %v660_v11, 0.0 }
  0x99   : > { %v321_v15 = vpop.f32.mrf.mxu0 }
  0x9a   : > { %v341_v16 = vmul.f32 0.5, %v321_v15 }
  0x9c   : > { %1242 = vtanh.f32 %v341_v16  ;;  %v613_v16 = vadd.s32 16, %v1514_v4 }
  0xa1   : > { %v323_v17 = vpop.f32.mrf.mxu0 }
  0xa2   : > { %v342_v18 = vmul.f32 0.5, %v323_v17  ;;  %v1243_v19 = vpop.eup %1242 }
  0xa3   : > { %v357_v20 = vmul.f32 0.5, %v1243_v19  ;;  %v1519_v19 = vand.u32 127, %v610_v3 }
  0xa4   : > { %1244 = vtanh.f32 %v342_v18  ;;  %v1135_v18 = vadd.f32 -8.0, %v660_v11 }
  0xa5   : > { %v365_v24 = vadd.f32 0.5, %v357_v20  ;;  %vm751_vm5 = vcmp.eq.s32.totalorder %v1519_v19, 1  ;;  %vm750_vm7 = vcmp.eq.s32.totalorder %v1519_v19, 0  ;;  %vm769_vm11 = vcmp.ge.s32.totalorder %v1519_v19, 2 }
  0xa6   : > { %vm770_vm12 = vcmp.lt.s32.totalorder %v1519_v19, 4  ;;  %vm768_vm14 = vcmp.lt.s32.totalorder %v1519_v19, 2 }
  0xa7   : > { %v373_v27 = vmul.f32 %v365_v24, %v321_v15  ;;  %v653_v15 = vmul.f32 8.0, %v645_v13  ;;  %v716_v24 = vadd.f32 8.0, %v660_v11 }
  0xa9   : > { %v326_v21 = vpop.f32.mrf.mxu0  ;;  %v661_v20 = vsub.f32 %v629_v10, %v653_v15 }
  0xaa   : > { %v1245_v22 = vpop.eup %1244  ;;  %v343_v23 = vmul.f32 0.5, %v326_v21 }
  0xab   : > { %v358_v25 = vmul.f32 0.5, %v1245_v22  ;;  %v700_v22 = vsel %vm684_vm2, %v692_v14, %v644_v7  ;;  %vm685_vm4 = vcmp.ge.f32.partialorder %v661_v20, 8.0  ;;  %vm669_vm6 = vcmp.lt.f32.partialorder %v661_v20, 0.0 }
  0xac   : > { %1246 = vtanh.f32 %v343_v23  ;;  %v693_v23 = vadd.f32 1.0, %v645_v13 }
  0xad   : > { %v366_v26 = vadd.f32 0.5, %v358_v25 }
  0xaf   : > { %v374_v28 = vmul.f32 %v366_v26, %v323_v17  ;;  %v1127_v17 = vadd.f32 -1.0, %v644_v7 }
  0xb1   : > { %v381_v29 = vpack.c.bf16 %v374_v28, %v373_v27  ;;  %v328_v30 = vpop.f32.mrf.mxu0  ;;  %v708_v26 = vsel %vm668_vm3, %v1127_v17, %v700_v22  ;;  %v732_v27 = vsel %vm684_vm2, %v1135_v18, %v660_v11  ;;  %v1128_v28 = vadd.f32 -1.0, %v645_v13  ;;  %vm1595_vm2 = vmand %vm769_vm11, %vm770_vm12 }
  0xb2   : > { %v344_v31 = vmul.f32 0.5, %v328_v30  ;;  %v1247_v32 = vpop.eup %1246 }
  0xb3   : > { %1115 = vmatmul.msk.bf16.vlgmr.msra.gmra.mxu1 %vm413_vm1, %v381_v29  ;;  %1119 = vmatmul.msk.bf16.vlgmr.msra.gmra.mxu2 %vm413_vm1, %v381_v29  ;;  %v359_v33 = vmul.f32 0.5, %v1247_v32  ;;  %v389_v32 = vld [vmem:[%s1918_s3] sm:$0x7] }
  0xb4   : > { %1248 = vtanh.f32 %v344_v31  ;;  %1123 = vmatmul.msk.bf16.vlgmr.msra.gmra.mxu3 %vm413_vm1, %v381_v29  ;;  %v1136_v29 = vadd.f32 -8.0, %v661_v20  ;;  %v701_v31 = vsel %vm685_vm4, %v693_v23, %v645_v13 }
  0xb5   : > { %v367_v37 = vadd.f32 0.5, %v359_v33  ;;  %v740_v33 = vsel %vm668_vm3, %v716_v24, %v732_v27 }
  0xb7   : > { %v375_v40 = vmul.f32 %v367_v37, %v326_v21  ;;  %v630_v21 = vcvt.s32.f32 %v613_v16 }
  0xb9   : > { %v331_v34 = vpop.f32.mrf.mxu0  ;;  %v638_v25 = vmul.f32 0.125, %v630_v21 }
  0xba   : > { %v1249_v35 = vpop.eup %1248  ;;  %v345_v36 = vmul.f32 0.5, %v331_v34 }
  0xbb   : > { %v360_v38 = vmul.f32 0.5, %v1249_v35 }
  0xbc   : > { %1250 = vtanh.f32 %v345_v36  ;;  %v717_v36 = vadd.f32 8.0, %v661_v20 }
  0xbd   : > { %v368_v39 = vadd.f32 0.5, %v360_v38  ;;  %v614_v38 = vadd.s32 24, %v1514_v4 }
  0xbf   : > { %v376_v41 = vmul.f32 %v368_v39, %v328_v30  ;;  %v646_v30 = vfloor.f32 %v638_v25  ;;  %v709_v39 = vsel %vm669_vm6, %v1128_v28, %v701_v31 }
  0xc1   : > { %v382_v42 = vpack.c.bf16 %v376_v41, %v375_v40  ;;  %v333_v43 = vpop.f32.mrf.mxu0  ;;  %v654_v35 = vmul.f32 8.0, %v646_v30  ;;  %v694_v37 = vadd.f32 1.0, %v646_v30  ;;  %v733_v40 = vsel %vm685_vm4, %v1136_v29, %v661_v20 }
  0xc2   : > { %v346_v44 = vmul.f32 0.5, %v333_v43  ;;  %v1251_v45 = vpop.eup %1250  ;;  %v1563_v29 = vadd.s32 40, %v1514_v4 }
  0xc3   : > { %1116 = vmatmul.msk.bf16.gmra.mxu1 %vm413_vm1, %v382_v42  ;;  %1120 = vmatmul.msk.bf16.gmra.mxu2 %vm413_vm1, %v382_v42  ;;  %v361_v46 = vmul.f32 0.5, %v1251_v45  ;;  %v662_v41 = vsub.f32 %v630_v21, %v654_v35  ;;  %v631_v45 = vcvt.s32.f32 %v614_v38 }
  0xc4   : > { %1252 = vtanh.f32 %v346_v44  ;;  %1124 = vmatmul.msk.bf16.gmra.mxu3 %vm413_vm1, %v382_v42  ;;  %v1129_v42 = vadd.f32 -1.0, %v646_v30 }
  0xc5   : > { %v369_v50 = vadd.f32 0.5, %v361_v46  ;;  %vm670_vm8 = vcmp.lt.f32.partialorder %v662_v41, 0.0  ;;  %vm686_vm9 = vcmp.ge.f32.partialorder %v662_v41, 8.0  ;;  %v718_v46 = vadd.f32 8.0, %v662_v41 }
  0xc7   : > { %v377_v53 = vmul.f32 %v369_v50, %v331_v34  ;;  %v752_v34 = vsel %vm751_vm5, %v708_v26, 0.0  ;;  %v702_v50 = vsel %vm686_vm9, %v694_v37, %v646_v30  ;;  %v633_v37 = vcvt.s32.f32 %v1563_v29 }
  0xc8   : > { %v760_v44 = vsel %vm750_vm7, %v740_v33, %v752_v34 }
  0xc9   : > { %v336_v47 = vpop.f32.mrf.mxu0 }
  0xca   : > { %v1253_v48 = vpop.eup %1252  ;;  %v347_v49 = vmul.f32 0.5, %v336_v47 }
  0xcb   : > { %v362_v51 = vmul.f32 0.5, %v1253_v48  ;;  %v741_v48 = vsel %vm669_vm6, %v717_v36, %v733_v40 }
  0xcc   : > { %1254 = vtanh.f32 %v347_v49  ;;  %v753_v49 = vsel %vm751_vm5, %v709_v39, 0.0 }
  0xcd   : > { %v370_v52 = vadd.f32 0.5, %v362_v51  ;;  %v639_v51 = vmul.f32 0.125, %v631_v45 }
  0xcf   : > { %v378_v54 = vmul.f32 %v370_v52, %v333_v43  ;;  %v1532_v43 = vperm.slane %v389_v32, 0  ;;  %v710_v52 = vsel %vm670_vm8, %v1129_v42, %v702_v50 }
  0xd1   : > { %v383_v55 = vpack.c.bf16 %v378_v54, %v377_v53  ;;  %v338_v56 = vpop.f32.mrf.mxu0  ;;  %v647_v54 = vfloor.f32 %v639_v51 }
  0xd2   : > { %v348_v57 = vmul.f32 0.5, %v338_v56  ;;  %v1255_v58 = vpop.eup %1254 }
  0xd3   : > { %1117 = vmatmul.msk.bf16.gmra.mxu1 %vm413_vm1, %v383_v55  ;;  %1121 = vmatmul.msk.bf16.gmra.mxu2 %vm413_vm1, %v383_v55  ;;  %v363_v59 = vmul.f32 0.5, %v1255_v58  ;;  %v695_v8 = vadd.f32 1.0, %v647_v54  ;;  %v1130_v9 = vadd.f32 -1.0, %v647_v54 }
  0xd4   : > { %1256 = vtanh.f32 %v348_v57  ;;  %1125 = vmatmul.msk.bf16.gmra.mxu3 %vm413_vm1, %v383_v55  ;;  %v761_v57 = vsel %vm750_vm7, %v741_v48, %v753_v49 }
  0xd5   : > { %v371_v61 = vadd.f32 0.5, %v363_v59  ;;  %v1144_v6 = vadd.f32 -0.5, %v761_v57 }
  0xd7   : > { %v379_v0 = vmul.f32 %v371_v61, %v336_v47  ;;  %v1137_v47 = vadd.f32 -8.0, %v662_v41  ;;  %v655_v61 = vmul.f32 8.0, %v647_v54  ;;  %v1566_v31 = vmul.f32 2.0, %v1144_v6 }
  0xd9   : > { %v734_v53 = vsel %vm686_vm9, %v1137_v47, %v662_v41 }
  0xda   : > { %v1257_v60 = vpop.eup %1256  ;;  %v742_v58 = vsel %vm670_vm8, %v718_v46, %v734_v53  ;;  %v1579_v46 = vld [vmem:[%s1919_s4] ss:$0 sm:$0xff] }
  0xdb   : > { %v364_v62 = vmul.f32 0.5, %v1257_v60  ;;  %v754_v60 = vsel %vm751_vm5, %v710_v52, 0.0 }
  0xdc   : > { %v762_v7 = vsel %vm750_vm7, %v742_v58, %v754_v60 }
  0xdd   : > { %v372_v63 = vadd.f32 0.5, %v364_v62  ;;  %v615_v62 = vadd.s32 32, %v1514_v4  ;;  %v1145_v17 = vadd.f32 -0.5, %v762_v7 }
  0xdf   : > { %v380_v1 = vmul.f32 %v372_v63, %v338_v56  ;;  %v1143_v56 = vadd.f32 -0.5, %v760_v44  ;;  %v1545_v63 = vperm.slane %v389_v32, 1  ;;  %v632_v3 = vcvt.s32.f32 %v615_v62 }
  0xe0   : > { %v1568_v36 = vmul.f32 2.0, %v1145_v17  ;;  %v641_v44 = vmul.f32 0.125, %v633_v37 }
  0xe1   : > { %v384_v2 = vpack.c.bf16 %v380_v1, %v379_v0  ;;  %v1547_v1 = vperm.slane %v389_v32, 2  ;;  %v1549_v5 = vmul.f32 2.0, %v1143_v56  ;;  %v640_v14 = vmul.f32 0.125, %v632_v3 }
  0xe2   : > { %v1587_v53 = vfloor.f32 %v641_v44 }
  0xe3   : > { %1118 = vmatmul.msk.bf16.gmra.mxu1 %vm413_vm1, %v384_v2  ;;  %1122 = vmatmul.msk.bf16.gmra.mxu2 %vm413_vm1, %v384_v2  ;;  %v648_v25 = vfloor.f32 %v640_v14 }
  0xe4   : > { %1126 = vmatmul.msk.bf16.gmra.mxu3 %vm413_vm1, %v384_v2  ;;  %v663_v2 = vsub.f32 %v631_v45, %v655_v61 }
  0xe5   : > { %v656_v33 = vmul.f32 8.0, %v648_v25  ;;  %v1131_v41 = vadd.f32 -1.0, %v648_v25  ;;  %v696_v42 = vadd.f32 1.0, %v648_v25 }
  0xe6   : > { %vm687_vm10 = vcmp.ge.f32.partialorder %v663_v2, 8.0  ;;  %v1138_v10 = vadd.f32 -8.0, %v663_v2  ;;  %vm671_vm13 = vcmp.lt.f32.partialorder %v663_v2, 0.0  ;;  %v719_v13 = vadd.f32 8.0, %v663_v2 }
  0xe7   : > { %v703_v12 = vsel %vm687_vm10, %v695_v8, %v647_v54  ;;  %v664_v40 = vsub.f32 %v632_v3, %v656_v33 }
  0xe8   : > { %v711_v18 = vsel %vm671_vm13, %v1130_v9, %v703_v12  ;;  %v735_v20 = vsel %vm687_vm10, %v1138_v10, %v663_v2 }
  0xe9   : > { %v743_v23 = vsel %vm671_vm13, %v719_v13, %v735_v20  ;;  %v755_v24 = vsel %vm751_vm5, %v711_v18, 0.0  ;;  %vm672_vm0 = vcmp.lt.f32.partialorder %v664_v40, 0.0  ;;  %vm688_vm1 = vcmp.ge.f32.partialorder %v664_v40, 8.0 }
  0xea   : > { %v763_v28 = vsel %vm750_vm7, %v743_v23, %v755_v24  ;;  %v720_v48 = vadd.f32 8.0, %v664_v40  ;;  %v704_v51 = vsel %vm688_vm1, %v696_v42, %v648_v25  ;;  %v1139_v52 = vadd.f32 -8.0, %v664_v40 }
  0xeb   : > { %v1146_v32 = vadd.f32 -0.5, %v763_v28  ;;  %v712_v58 = vsel %vm672_vm0, %v1131_v41, %v704_v51 }
  0xec   : > { %v756_v2 = vsel %vm751_vm5, %v712_v58, 0.0 }
  0xed   : > { %v1572_v39 = vmul.f32 2.0, %v1146_v32 }
 0x130   : > { %v435_v55 = vpop.f32.mrf.mxu1 }
 0x131   : > { %v436_v59 = vadd.f32 %v435_v55, %v1532_v43 }
 0x133   : > { %v513_v0 = vmul.f32 0.5, %v436_v59 }
 0x135   : > { %1258 = vtanh.f32 %v513_v0  ;;  %v736_v0 = vsel %vm688_vm1, %v1139_v52, %v664_v40 }
 0x136   : > { %v464_v11 = vpop.f32.mrf.mxu2  ;;  %v744_v13 = vsel %vm672_vm0, %v720_v48, %v736_v0 }
 0x137   : > { %v465_v15 = vadd.f32 %v464_v11, %v1545_v63  ;;  %v493_v16 = vpop.f32.mrf.mxu3 }
 0x138   : > { %v494_v21 = vadd.f32 %v493_v16, %v1547_v1  ;;  %v437_v22 = vpop.f32.mrf.mxu1  ;;  %v1611_v16 = vld [vmem:[%s1919_s4 + $0x1] ss:$0 sm:$0xff] }
 0x139   : > { %v514_v26 = vmul.f32 0.5, %v465_v15  ;;  %v438_v27 = vadd.f32 %v437_v22, %v1532_v43  ;;  %v764_v22 = vsel %vm750_vm7, %v744_v13, %v756_v2 }
 0x13a   : > { %v515_v30 = vmul.f32 0.5, %v494_v21  ;;  %v1618_v21 = vld [vmem:[%s1919_s4 + $0x2] ss:$0 sm:$0xff] }
 0x13b   : > { %v1259_v34 = vpop.eup %1258  ;;  %1260 = vtanh.f32 %v514_v26  ;;  %v516_v35 = vmul.f32 0.5, %v438_v27  ;;  %v1147_v27 = vadd.f32 -0.5, %v764_v22 }
 0x13c   : > { %v561_v38 = vmul.f32 0.5, %v1259_v34  ;;  %1262 = vtanh.f32 %v515_v30  ;;  %v1629_v34 = vmul.f32 8.0, %v1587_v53 }
 0x13d   : > { %1264 = vtanh.f32 %v516_v35 }
 0x13e   : > { %v585_v45 = vadd.f32 0.5, %v561_v38  ;;  %v466_v47 = vpop.f32.mrf.mxu2 }
 0x13f   : > { %v467_v49 = vadd.f32 %v466_v47, %v1545_v63  ;;  %v495_v50 = vpop.f32.mrf.mxu3 }
 0x140   : > { %v789_v54 = vmul.f32 4.0, %v585_v45  ;;  %v805_v55 = vmul.f32 %v585_v45, %v585_v45  ;;  %v496_v56 = vadd.f32 %v495_v50, %v1547_v1  ;;  %v440_v57 = vpop.f32.mrf.mxu1 }
 0x141   : > { %v1261_v59 = vpop.eup %1260  ;;  %v517_v61 = vmul.f32 0.5, %v467_v49  ;;  %v441_v62 = vadd.f32 %v440_v57, %v1532_v43 }
 0x142   : > { %v1263_v3 = vpop.eup %1262  ;;  %v797_v6 = vadd.f32 %v789_v54, %v1549_v5  ;;  %v816_v7 = vmul.f32 %v1579_v46, %v805_v55  ;;  %v562_v8 = vmul.f32 0.5, %v1261_v59  ;;  %v518_v9 = vmul.f32 0.5, %v496_v56 }
 0x143   : > { %v1265_v10 = vpop.eup %1264  ;;  %v563_v11 = vmul.f32 0.5, %v1263_v3  ;;  %1266 = vtanh.f32 %v517_v61  ;;  %v519_v12 = vmul.f32 0.5, %v441_v62 }
 0x144   : > { %v824_v14 = vsel %vm1595_vm2, %v816_v7, %v585_v45  ;;  %v586_v15 = vadd.f32 0.5, %v562_v8  ;;  %v564_v17 = vmul.f32 0.5, %v1265_v10  ;;  %1268 = vtanh.f32 %v518_v9 }
 0x145   : > { %v832_v18 = vsel %vm768_vm14, %v797_v6, %v824_v14  ;;  %v587_v20 = vadd.f32 0.5, %v563_v11  ;;  %1270 = vtanh.f32 %v519_v12  ;;  %v1657_v12 = vmul.f32 2.0, %v1147_v27 }
 0x146   : > { %841 = vst.msk [vmem:[%s1623_s8] sm:$0xff] %vm840_vm15, %v832_v18  ;;  %v850_v23 = vmul.f32 4.0, %v586_v15  ;;  %v866_v24 = vmul.f32 %v586_v15, %v586_v15  ;;  %v588_v25 = vadd.f32 0.5, %v564_v17  ;;  %v469_v26 = vpop.f32.mrf.mxu2 }
 0x147   : > { %v911_v28 = vmul.f32 4.0, %v587_v20  ;;  %v927_v30 = vmul.f32 %v587_v20, %v587_v20  ;;  %v470_v32 = vadd.f32 %v469_v26, %v1545_v63  ;;  %v498_v33 = vpop.f32.mrf.mxu3 }
 0x148   : > { %v858_v35 = vadd.f32 %v850_v23, %v1549_v5  ;;  %v877_v38 = vmul.f32 %v1611_v16, %v866_v24  ;;  %v790_v40 = vmul.f32 4.0, %v588_v25  ;;  %v806_v41 = vmul.f32 %v588_v25, %v588_v25  ;;  %v442_v42 = vpop.f32.mrf.mxu1 }
 0x149   : > { %v1267_v44 = vpop.eup %1266  ;;  %v919_v45 = vadd.f32 %v911_v28, %v1549_v5  ;;  %v938_v47 = vmul.f32 %v1618_v21, %v927_v30  ;;  %v520_v48 = vmul.f32 0.5, %v470_v32  ;;  %v499_v49 = vadd.f32 %v498_v33, %v1547_v1 }
 0x14a   : > { %v1269_v50 = vpop.eup %1268  ;;  %v885_v51 = vsel %vm1595_vm2, %v877_v38, %v586_v15  ;;  %v798_v52 = vadd.f32 %v790_v40, %v1566_v31  ;;  %v817_v54 = vmul.f32 %v1579_v46, %v806_v41  ;;  %v565_v55 = vmul.f32 0.5, %v1267_v44 }
 0x14b   : > { %v1271_v56 = vpop.eup %1270  ;;  %v893_v5 = vsel %vm768_vm14, %v858_v35, %v885_v51  ;;  %v946_v57 = vsel %vm1595_vm2, %v938_v47, %v587_v20  ;;  %v566_v58 = vmul.f32 0.5, %v1269_v50  ;;  %1272 = vtanh.f32 %v520_v48 }
 0x14c   : > { %1151 = vst.msk [vmem:[%s1623_s8 + $0x40] sm:$0xff] %vm840_vm15, %v893_v5  ;;  %v954_v59 = vsel %vm768_vm14, %v919_v45, %v946_v57  ;;  %v825_v61 = vsel %vm1595_vm2, %v817_v54, %v588_v25  ;;  %v589_v62 = vadd.f32 0.5, %v565_v55  ;;  %v567_v0 = vmul.f32 0.5, %v1271_v56 }
 0x14d   : > { %1159 = vst.msk [vmem:[%s1623_s8 + $0x80] sm:$0xff] %vm840_vm15, %v954_v59  ;;  %v833_v2 = vsel %vm768_vm14, %v798_v52, %v825_v61  ;;  %v590_v3 = vadd.f32 0.5, %v566_v58  ;;  %v521_v6 = vmul.f32 0.5, %v499_v49  ;;  %v443_v7 = vadd.f32 %v442_v42, %v1532_v43 }
 0x14e   : > { %842 = vst.msk [vmem:[%s1623_s8 + $0x8] sm:$0xff] %vm840_vm15, %v833_v2  ;;  %v851_v8 = vmul.f32 4.0, %v589_v62  ;;  %v867_v9 = vmul.f32 %v589_v62, %v589_v62  ;;  %v591_v10 = vadd.f32 0.5, %v567_v0  ;;  %v471_v11 = vpop.f32.mrf.mxu2  ;;  %v1687_v51 = vsub.f32 %v633_v37, %v1629_v34 }
 0x14f   : > { %v912_v13 = vmul.f32 4.0, %v590_v3  ;;  %v928_v14 = vmul.f32 %v590_v3, %v590_v3  ;;  %1274 = vtanh.f32 %v521_v6  ;;  %v522_v15 = vmul.f32 0.5, %v443_v7  ;;  %v500_v17 = vpop.f32.mrf.mxu3 }
 0x150   : > { %v859_v18 = vadd.f32 %v851_v8, %v1566_v31  ;;  %v878_v20 = vmul.f32 %v1611_v16, %v867_v9  ;;  %v791_v22 = vmul.f32 4.0, %v591_v10  ;;  %v807_v23 = vmul.f32 %v591_v10, %v591_v10  ;;  %v445_v24 = vpop.f32.mrf.mxu1 }
 0x151   : > { %v1273_v25 = vpop.eup %1272  ;;  %v920_v26 = vadd.f32 %v912_v13, %v1566_v31  ;;  %v939_v28 = vmul.f32 %v1618_v21, %v928_v14  ;;  %1276 = vtanh.f32 %v522_v15  ;;  %v472_v27 = vadd.f32 %v471_v11, %v1545_v63 }
 0x152   : > { %v886_v30 = vsel %vm1595_vm2, %v878_v20, %v589_v62  ;;  %v799_v32 = vadd.f32 %v791_v22, %v1568_v36  ;;  %v818_v33 = vmul.f32 %v1579_v46, %v807_v23  ;;  %v568_v35 = vmul.f32 0.5, %v1273_v25 }
 0x153   : > { %v894_v38 = vsel %vm768_vm14, %v859_v18, %v886_v30  ;;  %v947_v31 = vsel %vm1595_vm2, %v939_v28, %v590_v3  ;;  %v523_v40 = vmul.f32 0.5, %v472_v27  ;;  %v501_v41 = vadd.f32 %v500_v17, %v1547_v1 }
 0x154   : > { %1152 = vst.msk [vmem:[%s1623_s8 + $0x48] sm:$0xff] %vm840_vm15, %v894_v38  ;;  %v955_v42 = vsel %vm768_vm14, %v920_v26, %v947_v31  ;;  %v826_v44 = vsel %vm1595_vm2, %v818_v33, %v591_v10  ;;  %v592_v45 = vadd.f32 0.5, %v568_v35  ;;  %v446_v47 = vadd.f32 %v445_v24, %v1532_v43 }
 0x155   : > { %v1275_v48 = vpop.eup %1274  ;;  %1160 = vst.msk [vmem:[%s1623_s8 + $0x88] sm:$0xff] %vm840_vm15, %v955_v42  ;;  %v834_v49 = vsel %vm768_vm14, %v799_v32, %v826_v44  ;;  %1278 = vtanh.f32 %v523_v40  ;;  %v524_v50 = vmul.f32 0.5, %v501_v41  ;;  %vm673_vm3 = vcmp.lt.f32.partialorder %v1687_v51, 0.0 }
 0x156   : > { %843 = vst.msk [vmem:[%s1623_s8 + $0x10] sm:$0xff] %vm840_vm15, %v834_v49  ;;  %v852_v52 = vmul.f32 4.0, %v592_v45  ;;  %v868_v54 = vmul.f32 %v592_v45, %v592_v45  ;;  %v569_v55 = vmul.f32 0.5, %v1275_v48  ;;  %v525_v56 = vmul.f32 0.5, %v446_v47  ;;  %v474_v5 = vpop.f32.mrf.mxu2 }
 0x157   : > { %v1277_v57 = vpop.eup %1276  ;;  %1280 = vtanh.f32 %v524_v50  ;;  %v475_v58 = vadd.f32 %v474_v5, %v1545_v63  ;;  %v503_v59 = vpop.f32.mrf.mxu3  ;;  %v1132_v61 = vadd.f32 -1.0, %v1587_v53  ;;  %vm689_vm4 = vcmp.ge.f32.partialorder %v1687_v51, 8.0 }
 0x158   : > { %v860_v29 = vadd.f32 %v852_v52, %v1568_v36  ;;  %v879_v37 = vmul.f32 %v1611_v16, %v868_v54  ;;  %v593_v34 = vadd.f32 0.5, %v569_v55  ;;  %v570_v62 = vmul.f32 0.5, %v1277_v57  ;;  %v447_v0 = vpop.f32.mrf.mxu1 }
 0x159   : > { %1282 = vtanh.f32 %v525_v56  ;;  %v526_v2 = vmul.f32 0.5, %v475_v58  ;;  %v504_v3 = vadd.f32 %v503_v59, %v1547_v1  ;;  %v448_v6 = vadd.f32 %v447_v0, %v1532_v43 }
 0x15a   : > { %v887_v7 = vsel %vm1595_vm2, %v879_v37, %v592_v45  ;;  %v913_v8 = vmul.f32 4.0, %v593_v34  ;;  %v929_v9 = vmul.f32 %v593_v34, %v593_v34  ;;  %v594_v10 = vadd.f32 0.5, %v570_v62 }
 0x15b   : > { %v1279_v11 = vpop.eup %1278  ;;  %v895_v13 = vsel %vm768_vm14, %v860_v29, %v887_v7  ;;  %1284 = vtanh.f32 %v526_v2  ;;  %v527_v14 = vmul.f32 0.5, %v504_v3  ;;  %v528_v15 = vmul.f32 0.5, %v448_v6 }
 0x15c   : > { %1153 = vst.msk [vmem:[%s1623_s8 + $0x50] sm:$0xff] %vm840_vm15, %v895_v13  ;;  %v921_v17 = vadd.f32 %v913_v8, %v1568_v36  ;;  %v940_v18 = vmul.f32 %v1618_v21, %v929_v9  ;;  %v792_v20 = vmul.f32 4.0, %v594_v10  ;;  %v808_v22 = vmul.f32 %v594_v10, %v594_v10 }
 0x15d   : > { %v1281_v23 = vpop.eup %1280  ;;  %v571_v24 = vmul.f32 0.5, %v1279_v11  ;;  %1286 = vtanh.f32 %v527_v14  ;;  %v697_v25 = vadd.f32 1.0, %v1587_v53  ;;  %v721_v50 = vadd.f32 8.0, %v1687_v51 }
 0x15e   : > { %v948_v26 = vsel %vm1595_vm2, %v940_v18, %v593_v34  ;;  %v800_v28 = vadd.f32 %v792_v20, %v1572_v39  ;;  %v819_v27 = vmul.f32 %v1579_v46, %v808_v22  ;;  %v572_v36 = vmul.f32 0.5, %v1281_v23  ;;  %v476_v30 = vpop.f32.mrf.mxu2 }
 0x15f   : > { %v1283_v32 = vpop.eup %1282  ;;  %v956_v33 = vsel %vm768_vm14, %v921_v17, %v948_v26  ;;  %v595_v35 = vadd.f32 0.5, %v571_v24  ;;  %1288 = vtanh.f32 %v528_v15  ;;  %v705_v38 = vsel %vm689_vm4, %v697_v25, %v1587_v53  ;;  %v505_v31 = vpop.f32.mrf.mxu3 }
 0x160   : > { %1161 = vst.msk [vmem:[%s1623_s8 + $0x90] sm:$0xff] %vm840_vm15, %v956_v33  ;;  %v827_v40 = vsel %vm1595_vm2, %v819_v27, %v594_v10  ;;  %v596_v41 = vadd.f32 0.5, %v572_v36  ;;  %v573_v42 = vmul.f32 0.5, %v1283_v32  ;;  %v713_v44 = vsel %vm673_vm3, %v1132_v61, %v705_v38  ;;  %v450_v62 = vpop.f32.mrf.mxu1 }
 0x161   : > { %v1285_v45 = vpop.eup %1284  ;;  %v835_v47 = vsel %vm768_vm14, %v800_v28, %v827_v40  ;;  %v853_v48 = vmul.f32 4.0, %v595_v35  ;;  %v869_v49 = vmul.f32 %v595_v35, %v595_v35  ;;  %v1140_v58 = vadd.f32 -8.0, %v1687_v51 }
 0x162   : > { %844 = vst.msk [vmem:[%s1623_s8 + $0x18] sm:$0xff] %vm840_vm15, %v835_v47  ;;  %v914_v53 = vmul.f32 4.0, %v596_v41  ;;  %v930_v52 = vmul.f32 %v596_v41, %v596_v41  ;;  %v597_v54 = vadd.f32 0.5, %v573_v42  ;;  %v574_v55 = vmul.f32 0.5, %v1285_v45 }
 0x163   : > { %v1287_v56 = vpop.eup %1286  ;;  %v861_v5 = vadd.f32 %v853_v48, %v1572_v39  ;;  %v880_v57 = vmul.f32 %v1611_v16, %v869_v49  ;;  %v757_v59 = vsel %vm751_vm5, %v713_v44, 0.0  ;;  %v737_v7 = vsel %vm689_vm4, %v1140_v58, %v1687_v51 }
 0x164   : > { %v922_v61 = vadd.f32 %v914_v53, %v1572_v39  ;;  %v941_v29 = vmul.f32 %v1618_v21, %v930_v52  ;;  %v793_v37 = vmul.f32 4.0, %v597_v54  ;;  %v809_v34 = vmul.f32 %v597_v54, %v597_v54 }
 0x165   : > { %v1289_v0 = vpop.eup %1288  ;;  %v888_v2 = vsel %vm1595_vm2, %v880_v57, %v595_v35  ;;  %v598_v3 = vadd.f32 0.5, %v574_v55  ;;  %v575_v6 = vmul.f32 0.5, %v1287_v56  ;;  %v745_v23 = vsel %vm673_vm3, %v721_v50, %v737_v7 }
 0x166   : > { %v896_v8 = vsel %vm768_vm14, %v861_v5, %v888_v2  ;;  %v949_v39 = vsel %vm1595_vm2, %v941_v29, %v596_v41  ;;  %v801_v9 = vadd.f32 %v793_v37, %v1657_v12  ;;  %v820_v10 = vmul.f32 %v1579_v46, %v809_v34  ;;  %v479_v11 = vpop.f32.mrf.mxu2 }
 0x167   : > { %1154 = vst.msk [vmem:[%s1623_s8 + $0x58] sm:$0xff] %vm840_vm15, %v896_v8  ;;  %v957_v13 = vsel %vm768_vm14, %v922_v61, %v949_v39  ;;  %v854_v14 = vmul.f32 4.0, %v598_v3  ;;  %v870_v15 = vmul.f32 %v598_v3, %v598_v3  ;;  %v599_v17 = vadd.f32 0.5, %v575_v6  ;;  %v508_v18 = vpop.f32.mrf.mxu3 }
 0x168   : > { %1162 = vst.msk [vmem:[%s1623_s8 + $0x98] sm:$0xff] %vm840_vm15, %v957_v13  ;;  %v828_v20 = vsel %vm1595_vm2, %v820_v10, %v597_v54  ;;  %v576_v22 = vmul.f32 0.5, %v1289_v0  ;;  %v477_v24 = vadd.f32 %v476_v30, %v1545_v63  ;;  %v765_v33 = vsel %vm750_vm7, %v745_v23, %v757_v59  ;;  %v452_v52 = vpop.f32.mrf.mxu1 }
 0x169   : > { %v836_v25 = vsel %vm768_vm14, %v801_v9, %v828_v20  ;;  %v862_v26 = vadd.f32 %v854_v14, %v1657_v12  ;;  %v881_v28 = vmul.f32 %v1611_v16, %v870_v15  ;;  %v915_v27 = vmul.f32 4.0, %v599_v17 }
 0x16a   : > { %845 = vst.msk [vmem:[%s1623_s8 + $0x20] sm:$0xff] %vm840_vm15, %v836_v25  ;;  %v931_v36 = vmul.f32 %v599_v17, %v599_v17  ;;  %v600_v32 = vadd.f32 0.5, %v576_v22  ;;  %v529_v51 = vmul.f32 0.5, %v477_v24  ;;  %v1148_v38 = vadd.f32 -0.5, %v765_v33 }
 0x16b   : > { %v889_v30 = vsel %vm1595_vm2, %v881_v28, %v598_v3  ;;  %v923_v35 = vadd.f32 %v915_v27, %v1657_v12  ;;  %v506_v40 = vadd.f32 %v505_v31, %v1547_v1  ;;  %v451_v49 = vadd.f32 %v450_v62, %v1532_v43 }
 0x16c   : > { %v897_v41 = vsel %vm768_vm14, %v862_v26, %v889_v30  ;;  %v942_v42 = vmul.f32 %v1618_v21, %v931_v36  ;;  %v794_v44 = vmul.f32 4.0, %v600_v32  ;;  %v810_v45 = vmul.f32 %v600_v32, %v600_v32 }
 0x16d   : > { %1155 = vst.msk [vmem:[%s1623_s8 + $0x60] sm:$0xff] %vm840_vm15, %v897_v41  ;;  %v1774_v47 = vmul.f32 2.0, %v1148_v38  ;;  %1290 = vtanh.f32 %v529_v51  ;;  %v530_v48 = vmul.f32 0.5, %v506_v40  ;;  %v617_v50 = vadd.s32 48, %v1514_v4 }
 0x16e   : > { %v950_v12 = vsel %vm1595_vm2, %v942_v42, %v599_v17  ;;  %v821_v31 = vmul.f32 %v1579_v46, %v810_v45  ;;  %v480_v53 = vadd.f32 %v479_v11, %v1545_v63  ;;  %v531_v56 = vmul.f32 0.5, %v451_v49  ;;  %v481_v5 = vpop.f32.mrf.mxu2 }
 0x16f   : > { %v958_v54 = vsel %vm768_vm14, %v923_v35, %v950_v12  ;;  %v802_v55 = vadd.f32 %v794_v44, %v1774_v47  ;;  %1292 = vtanh.f32 %v530_v48  ;;  %v634_v58 = vcvt.s32.f32 %v617_v50  ;;  %v510_v29 = vpop.f32.mrf.mxu3 }
 0x170   : > { %1163 = vst.msk [vmem:[%s1623_s8 + $0xa0] sm:$0xff] %vm840_vm15, %v958_v54  ;;  %v829_v57 = vsel %vm1595_vm2, %v821_v31, %v600_v32  ;;  %v532_v59 = vmul.f32 0.5, %v480_v53  ;;  %v509_v61 = vadd.f32 %v508_v18, %v1547_v1  ;;  %1294 = vtanh.f32 %v531_v56 }
 0x171   : > { %v837_v37 = vsel %vm768_vm14, %v802_v55, %v829_v57  ;;  %v453_v34 = vadd.f32 %v452_v52, %v1532_v43  ;;  %v1794_v62 = vadd.s32 56, %v1514_v4  ;;  %v642_v0 = vmul.f32 0.125, %v634_v58 }
 0x172   : > { %846 = vst.msk [vmem:[%s1623_s8 + $0x28] sm:$0xff] %vm840_vm15, %v837_v37  ;;  %1296 = vtanh.f32 %v532_v59  ;;  %v533_v2 = vmul.f32 0.5, %v509_v61  ;;  %v482_v3 = vadd.f32 %v481_v5, %v1545_v63  ;;  %v511_v39 = vadd.f32 %v510_v29, %v1547_v1 }
 0x173   : > { %v1291_v6 = vpop.eup %1290  ;;  %v534_v7 = vmul.f32 0.5, %v453_v34  ;;  %v635_v8 = vcvt.s32.f32 %v1794_v62  ;;  %v650_v10 = vfloor.f32 %v642_v0 }
 0x174   : > { %v577_v9 = vmul.f32 0.5, %v1291_v6  ;;  %1298 = vtanh.f32 %v533_v2  ;;  %v535_v4 = vmul.f32 0.5, %v482_v3  ;;  %v1801_v22 = vmul.f32 0.5, %v511_v39 }
 0x175   : > { %v1293_v11 = vpop.eup %1292  ;;  %v643_v43 = vmul.f32 0.125, %v635_v8  ;;  %v658_v15 = vmul.f32 8.0, %v650_v10  ;;  %1300 = vtanh.f32 %v534_v7  ;;  %v1133_v18 = vadd.f32 -1.0, %v650_v10 }
 0x176   : > { %v601_v13 = vadd.f32 0.5, %v577_v9  ;;  %v578_v14 = vmul.f32 0.5, %v1293_v11  ;;  %v1295_v17 = vpop.eup %1294  ;;  %v698_v20 = vadd.f32 1.0, %v650_v10  ;;  %1302 = vtanh.f32 %v535_v4 }
 0x177   : > { %v651_v63 = vfloor.f32 %v643_v43  ;;  %v579_v26 = vmul.f32 0.5, %v1295_v17  ;;  %v666_v28 = vsub.f32 %v634_v58, %v658_v15  ;;  %1304 = vtanh.f32 %v1801_v22 }
 0x178   : > { %v1297_v23 = vpop.eup %1296  ;;  %v855_v24 = vmul.f32 4.0, %v601_v13  ;;  %v871_v25 = vmul.f32 %v601_v13, %v601_v13  ;;  %v602_v1 = vadd.f32 0.5, %v578_v14 }
 0x179   : > { %v580_v27 = vmul.f32 0.5, %v1297_v23  ;;  %v659_v36 = vmul.f32 8.0, %v651_v63  ;;  %v603_v38 = vadd.f32 0.5, %v579_v26  ;;  %vm674_vm6 = vcmp.lt.f32.partialorder %v666_v28, 0.0 }
 0x17a   : > { %v863_v32 = vadd.f32 %v855_v24, %v1774_v47  ;;  %v882_v33 = vmul.f32 %v1611_v16, %v871_v25  ;;  %v916_v51 = vmul.f32 4.0, %v602_v1  ;;  %v932_v30 = vmul.f32 %v602_v1, %v602_v1  ;;  %v1299_v35 = vpop.eup %1298 }
 0x17b   : > { %vm690_vm8 = vcmp.ge.f32.partialorder %v666_v28, 8.0  ;;  %v722_v40 = vadd.f32 8.0, %v666_v28  ;;  %v1301_v41 = vpop.eup %1300  ;;  %v1141_v31 = vadd.f32 -8.0, %v666_v28  ;;  %v1134_v50 = vadd.f32 -1.0, %v651_v63 }
 0x17c   : > { %v890_v42 = vsel %vm1595_vm2, %v882_v33, %v601_v13  ;;  %v924_v44 = vadd.f32 %v916_v51, %v1774_v47  ;;  %v943_v45 = vmul.f32 %v1618_v21, %v932_v30  ;;  %v706_v48 = vsel %vm690_vm8, %v698_v20, %v650_v10  ;;  %v1303_v55 = vpop.eup %1302 }
 0x17d   : > { %v898_v49 = vsel %vm768_vm14, %v863_v32, %v890_v42  ;;  %v714_v12 = vsel %vm674_vm6, %v1133_v18, %v706_v48  ;;  %v811_v52 = vmul.f32 %v603_v38, %v603_v38  ;;  %v604_v54 = vadd.f32 0.5, %v580_v27  ;;  %v1305_v48 = vpop.eup %1304 }
 0x17e   : > { %1156 = vst.msk [vmem:[%s1623_s8 + $0x68] sm:$0xff] %vm840_vm15, %v898_v49  ;;  %v951_v53 = vsel %vm1595_vm2, %v943_v45, %v602_v1  ;;  %v758_v47 = vsel %vm751_vm5, %v714_v12, 0.0  ;;  %v738_v5 = vsel %vm690_vm8, %v1141_v31, %v666_v28  ;;  %v581_v57 = vmul.f32 0.5, %v1299_v35 }
 0x17f   : > { %v959_v56 = vsel %vm768_vm14, %v924_v44, %v951_v53  ;;  %v582_v58 = vmul.f32 0.5, %v1301_v41  ;;  %v746_v59 = vsel %vm674_vm6, %v722_v40, %v738_v5  ;;  %v795_v61 = vmul.f32 4.0, %v603_v38 }
 0x180   : > { %1164 = vst.msk [vmem:[%s1623_s8 + $0xa8] sm:$0xff] %vm840_vm15, %v959_v56  ;;  %v822_v29 = vmul.f32 %v1579_v46, %v811_v52  ;;  %v872_v37 = vmul.f32 %v604_v54, %v604_v54  ;;  %v766_v34 = vsel %vm750_vm7, %v746_v59, %v758_v47  ;;  %v856_v62 = vmul.f32 4.0, %v604_v54 }
 0x181   : > { %v605_v0 = vadd.f32 0.5, %v581_v57  ;;  %v667_v2 = vsub.f32 %v635_v8, %v659_v36  ;;  %v1149_v3 = vadd.f32 -0.5, %v766_v34  ;;  %v606_v7 = vadd.f32 0.5, %v582_v58 }
 0x182   : > { %v883_v6 = vmul.f32 %v1611_v16, %v872_v37  ;;  %v699_v39 = vadd.f32 1.0, %v651_v63  ;;  %v830_v43 = vsel %vm1595_vm2, %v822_v29, %v603_v38  ;;  %v583_v26 = vmul.f32 0.5, %v1303_v55 }
 0x183   : > { %v917_v9 = vmul.f32 4.0, %v605_v0  ;;  %v933_v10 = vmul.f32 %v605_v0, %v605_v0  ;;  %vm675_vm9 = vcmp.lt.f32.partialorder %v667_v2, 0.0  ;;  %vm691_vm10 = vcmp.ge.f32.partialorder %v667_v2, 8.0 }
 0x184   : > { %v786_v11 = vmul.f32 2.0, %v1149_v3  ;;  %v707_v4 = vsel %vm691_vm10, %v699_v39, %v651_v63  ;;  %v723_v13 = vadd.f32 8.0, %v667_v2  ;;  %v891_v14 = vsel %vm1595_vm2, %v883_v6, %v604_v54 }
 0x185   : > { %v944_v8 = vmul.f32 %v1618_v21, %v933_v10  ;;  %v715_v15 = vsel %vm675_vm9, %v1134_v50, %v707_v4  ;;  %v1142_v17 = vadd.f32 -8.0, %v667_v2  ;;  %v812_v1 = vmul.f32 %v606_v7, %v606_v7 }
 0x186   : > { %v803_v18 = vadd.f32 %v795_v61, %v786_v11  ;;  %v864_v20 = vadd.f32 %v856_v62, %v786_v11  ;;  %v925_v23 = vadd.f32 %v917_v9, %v786_v11  ;;  %v759_v24 = vsel %vm751_vm5, %v715_v15, 0.0 }
 0x187   : > { %v952_v63 = vsel %vm1595_vm2, %v944_v8, %v605_v0  ;;  %v739_v25 = vsel %vm691_vm10, %v1142_v17, %v667_v2  ;;  %v823_v51 = vmul.f32 %v1579_v46, %v812_v1  ;;  %v607_v30 = vadd.f32 0.5, %v583_v26 }
 0x188   : > { %v838_v28 = vsel %vm768_vm14, %v803_v18, %v830_v43  ;;  %v899_v27 = vsel %vm768_vm14, %v864_v20, %v891_v14  ;;  %v960_v36 = vsel %vm768_vm14, %v925_v23, %v952_v63  ;;  %v747_v32 = vsel %vm675_vm9, %v723_v13, %v739_v25 }
 0x189   : > { %847 = vst.msk [vmem:[%s1623_s8 + $0x30] sm:$0xff] %vm840_vm15, %v838_v28  ;;  %v767_v33 = vsel %vm750_vm7, %v747_v32, %v759_v24  ;;  %v796_v38 = vmul.f32 4.0, %v606_v7  ;;  %v857_v40 = vmul.f32 4.0, %v607_v30  ;;  %v873_v41 = vmul.f32 %v607_v30, %v607_v30 }
 0x18a   : > { %1157 = vst.msk [vmem:[%s1623_s8 + $0x70] sm:$0xff] %vm840_vm15, %v899_v27  ;;  %v1150_v35 = vadd.f32 -0.5, %v767_v33  ;;  %v831_v44 = vsel %vm1595_vm2, %v823_v51, %v606_v7  ;;  %v584_v50 = vmul.f32 0.5, %v1305_v48 }
 0x18b   : > { %1165 = vst.msk [vmem:[%s1623_s8 + $0xb0] sm:$0xff] %vm840_vm15, %v960_v36  ;;  %v884_v46 = vmul.f32 %v1611_v16, %v873_v41 }
 0x18c   : > { %v787_v42 = vmul.f32 2.0, %v1150_v35  ;;  %v608_v16 = vadd.f32 0.5, %v584_v50 }
 0x18d   : > { %v892_v49 = vsel %vm1595_vm2, %v884_v46, %v607_v30 }
 0x18e   : > { %v804_v45 = vadd.f32 %v796_v38, %v787_v42  ;;  %v865_v22 = vadd.f32 %v857_v40, %v787_v42  ;;  %v918_v53 = vmul.f32 4.0, %v608_v16  ;;  %v934_v47 = vmul.f32 %v608_v16, %v608_v16 }
 0x190   : > { %v839_v12 = vsel %vm768_vm14, %v804_v45, %v831_v44  ;;  %v900_v31 = vsel %vm768_vm14, %v865_v22, %v892_v49  ;;  %v926_v52 = vadd.f32 %v918_v53, %v787_v42  ;;  %v945_v54 = vmul.f32 %v1618_v21, %v934_v47 }
 0x191   : > { %848 = vst.msk [vmem:[%s1623_s8 + $0x38] sm:$0xff] %vm840_vm15, %v839_v12 }
 0x192   : > { %1158 = vst.msk [vmem:[%s1623_s8 + $0x78] sm:$0xff] %vm840_vm15, %v900_v31  ;;  %v953_v55 = vsel %vm1595_vm2, %v945_v54, %v608_v16 }
 0x193   : > { %v961_v56 = vsel %vm768_vm14, %v926_v52, %v953_v55 }
 0x194   : > { %1166 = vst.msk [vmem:[%s1623_s8 + $0xb8] sm:$0xff] %vm840_vm15, %v961_v56 }
 0x195   : > { %1333 = shalt.err (!%p1330_p5)
}
 0x196   : > { %s1386_s15 = smov 128   ;;  %s1387_s8 = smov 8  }
 0x197   : > { %1182 = dma.vmem_to_hbm [thread:$0]  (%p1458_p4), %s987_s12, 3072, %s989_s13, %s972_s14, %s1386_s15, %s1386_s15, %s1387_s8  }
 0x198 PF: > { %p1188_p6 = scmp.ge.s32.totalorder %s1384_s23, 2  ;;  %s1003_s9 = sand.u32 1, %s1364_s18  }
 0x199   : > { %s1004_s10 = scalar_lea.sflag [#allocation3], %s1003_s9 }
 0x19a   : > { %p1185_p7 = pnand %p1188_p6, %p1465_p8 }
 0x19c   : > { %p1186_p9 = pneg %p1185_p7 }
 0x19e   : > { %1359 = dma.done.wait (%p1186_p9), %s1004_s10, 3072  }
 0x19f   : > { %1361 = vsyncadd (%p1186_p9), %s1004_s10, 4294964224  ;;  %s18_s23 = sadd.s32 1, %s1384_s23   ;;  %s1925_s18 = smov %s1368_s19 }
 0x1a0   : > { %p15_p10 = scmp.ge.s32.totalorder %s18_s23, 4   ;;  %s1926_s19 = smov %s1372_s20 }
 0x1a1   : > { %s1927_s20 = smov %s1471_s6  ;;  %s1928_s21 = smov %s1380_s22 }
 0x1a2   : > { %s1929_s22 = smov %s1931_s26  ;;  %17 = sbr.rel (!%p15_p10) target bundleno = 4 (0x4), region = 77 }
 0x1a7   :  { %1010 = vsyncpa [#allocation3], 1 }
 0x1a8   :  { %1012 = vsyncpa [#allocation3 + $0x1], 1 }

</bundles_post_ra>
